<compile_context>
chip_gen: v5e
topology: v5e:2x2
jax: 0.10.0
libtpu: 0.0.40
codegen_flags: <defaults>
</compile_context>

<pallas_src>
import jax
import jax.numpy as jnp
from jax.experimental import pallas as pl
from jax.experimental.pallas import tpu as pltpu


# ---------------------------------------------------------------------------
# Pallas kernels
# ---------------------------------------------------------------------------
def _conv_bn_relu_kernel(p_ref, w_ref, shift_ref, o_ref):
    # p_ref:     (tm, K)    bf16 im2col patches tile (K already BN-scale-folded
    #                        into w_ref, zero-padded to a multiple of 128)
    # w_ref:     (K, Cout)  bf16 folded weights
    # shift_ref: (1, Cout)  f32 folded BN shift
    # o_ref:     (tm, Cout)
    acc = jnp.dot(p_ref[...], w_ref[...], preferred_element_type=jnp.float32)
    o_ref[...] = jnp.maximum(acc + shift_ref[...], 0.0).astype(o_ref.dtype)


def _conv_bn_relu_x2_kernel(p_ref, w1_ref, s1_ref, w2_ref, s2_ref, o_ref):
    # Fused conv3 (3x3) + conv_out (1x1). The 64-channel conv3 activation stays
    # in VMEM/vregs; only the lane-dense 128-channel result is stored.
    a1 = jnp.dot(p_ref[...], w1_ref[...], preferred_element_type=jnp.float32)
    h = jnp.maximum(a1 + s1_ref[...], 0.0).astype(jnp.bfloat16)
    a2 = jnp.dot(h, w2_ref[...], preferred_element_type=jnp.float32)
    o_ref[...] = jnp.maximum(a2 + s2_ref[...], 0.0).astype(o_ref.dtype)


# ---------------------------------------------------------------------------
# Tiled pallas_call driver
# ---------------------------------------------------------------------------
_TM_TARGET = 512                 # sweet spot per mem-bound tiling measurements
_VMEM_LIMIT_BYTES = 32 * 1024 * 1024   # explicit; safe on v5e/v6e/v7x


def _round_up(x, m):
    return (x + m - 1) // m * m


def _pallas_fused(kernel, patches, side_inputs, cout, out_dtype):
    """patches: (M, K) bf16; side_inputs: small (weights/shifts) arrays."""
    M, K = patches.shape

    # Tile over M only (K and Cout fit in one block for this network).
    tm = min(_TM_TARGET, _round_up(M, 8))
    Mp = _round_up(M, tm)
    if Mp != M:  # cdiv-style grid via zero-padded tail rows (sliced off below)
        patches = jnp.pad(patches, ((0, Mp - M), (0, 0)))
    grid = (Mp // tm,)

    in_specs = [pl.BlockSpec((tm, K), lambda i: (i, 0))]
    in_specs += [pl.BlockSpec(a.shape, lambda i: (0, 0)) for a in side_inputs]

    out = pl.pallas_call(
        kernel,
        out_shape=jax.ShapeDtypeStruct((Mp, cout), out_dtype),
        grid_spec=pltpu.PrefetchScalarGridSpec(
            num_scalar_prefetch=0,
            grid=grid,
            in_specs=in_specs,
            out_specs=pl.BlockSpec((tm, cout), lambda i: (i, 0)),
        ),
        compiler_params=pltpu.CompilerParams(
            dimension_semantics=("parallel",),      # megacore-shardable on v7x
            vmem_limit_bytes=_VMEM_LIMIT_BYTES,
        ),
    )(patches, *side_inputs)

    return out[:M] if Mp != M else out


# ---------------------------------------------------------------------------
# Glue: im2col, BN folding
# ---------------------------------------------------------------------------
def _im2col_nhwc(x, ks, stride, padding, k_pad):
    """x: (N, H, W, C) -> patches (N*OH*OW, k_pad) bf16, plus (N, OH, OW)."""
    N, H, W, C = x.shape
    OH = (H + 2 * padding - ks) // stride + 1
    OW = (W + 2 * padding - ks) // stride + 1
    xp = jnp.pad(x, ((0, 0), (padding, padding), (padding, padding), (0, 0)))
    cols = []
    for kh in range(ks):
        for kw in range(ks):
            cols.append(xp[:, kh:kh + (OH - 1) * stride + 1:stride,
                              kw:kw + (OW - 1) * stride + 1:stride, :])
    # (N, OH, OW, ks*ks, C): (kh, kw, c) ordering matches the weight reshape.
    patches = jnp.stack(cols, axis=-2).reshape(N * OH * OW, ks * ks * C)
    K = ks * ks * C
    if k_pad > K:  # zero-pad K to a 128 multiple -> unmasked vld, aligned MXU K
        patches = jnp.pad(patches, ((0, 0), (0, k_pad - K)))
    return patches.astype(jnp.bfloat16), (N, OH, OW)


def _fold_bn(params, k_pad=None):
    """Fold eval-mode BN into the conv weight (scale) and a shift vector."""
    w, gamma, beta, mean, var, eps = (
        params["w"], params["gamma"], params["beta"],
        params["mean"], params["var"], params["eps"],
    )
    Cout, Cin, KH, KW = w.shape
    # (Cout, Cin, KH, KW) -> (KH, KW, Cin, Cout) -> (KH*KW*Cin, Cout)
    w2d = jnp.transpose(w, (2, 3, 1, 0)).reshape(KH * KW * Cin, Cout)
    inv_std = 1.0 / jnp.sqrt(var + eps)
    scale = gamma * inv_std
    shift = (beta - mean * scale).reshape(1, Cout).astype(jnp.float32)
    w2d = w2d * scale[None, :]                       # BN scale folded into W
    if k_pad is not None and k_pad > w2d.shape[0]:
        w2d = jnp.pad(w2d, ((0, k_pad - w2d.shape[0]), (0, 0)))
    return w2d.astype(jnp.bfloat16), shift


# ---------------------------------------------------------------------------
# Layer drivers
# ---------------------------------------------------------------------------
def conv_bn_relu(x_nhwc, params, ks, stride, padding, out_dtype=jnp.bfloat16):
    """One ConvBNReLU layer. x_nhwc: (N, H, W, Cin) -> (N, OH, OW, Cout)."""
    Cout, Cin = params["w"].shape[0], params["w"].shape[1]
    k_pad = _round_up(ks * ks * Cin, 128)
    w2d, shift = _fold_bn(params, k_pad)
    patches, (N, OH, OW) = _im2col_nhwc(x_nhwc, ks, stride, padding, k_pad)
    out = _pallas_fused(_conv_bn_relu_kernel, patches, (w2d, shift), Cout, out_dtype)
    return out.reshape(N, OH, OW, Cout)


def conv_bn_relu_plus_1x1(x_nhwc, params_a, params_b, ks, stride, padding,
                          out_dtype=jnp.float32):
    """Fused: ConvBNReLU(ks,stride) followed by a 1x1/stride-1 ConvBNReLU."""
    Cout2, Cin = params_b["w"].shape[0], params_a["w"].shape[1]
    k_pad = _round_up(ks * ks * Cin, 128)
    w1, s1 = _fold_bn(params_a, k_pad)
    w2, s2 = _fold_bn(params_b)                       # (Cmid, Cout2)
    patches, (N, OH, OW) = _im2col_nhwc(x_nhwc, ks, stride, padding, k_pad)
    out = _pallas_fused(_conv_bn_relu_x2_kernel, patches,
                        (w1, s1, w2, s2), Cout2, out_dtype)
    return out.reshape(N, OH, OW, Cout2)


# ---------------------------------------------------------------------------
# Parameter init (deterministic, mirrors module __init__ shapes)
# ---------------------------------------------------------------------------
def _init_convbnrelu_params(key, in_chan, out_chan, ks):
    kw_, kg_, kb_, km_, kv_ = jax.random.split(key, 5)
    fan_in = in_chan * ks * ks
    # kaiming_normal_(a=1): gain = sqrt(2/(1+a^2)) = 1, std = 1/sqrt(fan_in)
    w = jax.random.normal(kw_, (out_chan, in_chan, ks, ks), jnp.float32) / jnp.sqrt(fan_in)
    gamma = 1.0 + 0.1 * jax.random.normal(kg_, (out_chan,), jnp.float32)
    beta = 0.1 * jax.random.normal(kb_, (out_chan,), jnp.float32)
    mean = 0.1 * jax.random.normal(km_, (out_chan,), jnp.float32)
    var = jnp.abs(jax.random.normal(kv_, (out_chan,), jnp.float32)) + 0.5
    return dict(w=w, gamma=gamma, beta=beta, mean=mean, var=var, eps=1e-5)


def init_spatial_path_params(key):
    k1, k2, k3, k4 = jax.random.split(key, 4)
    return {
        "conv1": _init_convbnrelu_params(k1, 3, 64, 7),
        "conv2": _init_convbnrelu_params(k2, 64, 64, 3),
        "conv3": _init_convbnrelu_params(k3, 64, 64, 3),
        "conv_out": _init_convbnrelu_params(k4, 64, 128, 1),
    }


# ---------------------------------------------------------------------------
# SpatialPath forward
# ---------------------------------------------------------------------------
@jax.jit
def spatial_path_forward(x_nchw, params):
    """x_nchw: (N, 3, H, W) float32 -> (N, 128, H/8, W/8) float32."""
    x = jnp.transpose(x_nchw, (0, 2, 3, 1)).astype(jnp.bfloat16)  # NCHW -> NHWC
    feat = conv_bn_relu(x, params["conv1"], ks=7, stride=2, padding=3)      # 64 ch
    feat = conv_bn_relu(feat, params["conv2"], ks=3, stride=2, padding=1)   # 64 ch
    # conv3 + conv_out fused: lane-dense 128-channel output, one less HBM trip.
    feat = conv_bn_relu_plus_1x1(feat, params["conv3"], params["conv_out"],
                                 ks=3, stride=2, padding=1)                  # 128 ch, f32
    return jnp.transpose(feat, (0, 3, 1, 2))  # NHWC -> NCHW


if __name__ == "__main__":
    key = jax.random.PRNGKey(0)
    kx, kp = jax.random.split(key)

    # Small deterministic input consistent with the module (in_chan = 3).
    x = jax.random.normal(kx, (2, 3, 16, 16), jnp.float32)
    params = init_spatial_path_params(kp)

    out = spatial_path_forward(x, params)
    out = jax.block_until_ready(out)

    assert out.shape == (2, 128, 2, 2), out.shape
    assert out.dtype == jnp.float32
    assert bool(jnp.all(jnp.isfinite(out)))
    print("KERNEL_OK")
</pallas_src>

<mosaic_0001>
module attributes {stable_mosaic.version = 11 : i64} {
  func.func @_conv_bn_relu_kernel(%arg0: i32, %arg1: memref<128x256xbf16, #tpu.memory_space<vmem>>, %arg2: memref<256x64xbf16, #tpu.memory_space<vmem>>, %arg3: memref<1x64xf32, #tpu.memory_space<vmem>>, %arg4: memref<128x64xbf16, #tpu.memory_space<vmem>>) attributes {dimension_semantics = [#tpu.dimension_semantics<parallel>], iteration_bounds = array<i64: 1>, scalar_prefetch = 0 : i64, scratch_operands = 0 : i64, tpu.core_type = #tpu.core_type<tc>, window_params = [{transform_indices = @transform_0, window_bounds = array<i64: 128, 256>}, {pipeline_mode = #tpu.pipeline_mode<synchronous>, transform_indices = @transform_1, window_bounds = array<i64: 256, 64>}, {pipeline_mode = #tpu.pipeline_mode<synchronous>, transform_indices = @transform_2, window_bounds = array<i64: 1, 64>}, {transform_indices = @transform_3, window_bounds = array<i64: 128, 64>}]} {
    %c0 = arith.constant 0 : index
    %c0_0 = arith.constant 0 : index
    %0 = vector.load %arg1[%c0, %c0_0] : memref<128x256xbf16, #tpu.memory_space<vmem>>, vector<128x256xbf16>
    %c0_1 = arith.constant 0 : index
    %c0_2 = arith.constant 0 : index
    %1 = vector.load %arg2[%c0_1, %c0_2] : memref<256x64xbf16, #tpu.memory_space<vmem>>, vector<256x64xbf16>
    %cst = arith.constant dense<0.000000e+00> : vector<128x64xf32>
    %2 = tpu.matmul %0, %1, %cst {dimension_numbers = #tpu.dot_dimension_numbers<[1], [0], [0], [1], [0, 0, 1, 1], [], []>} : vector<128x256xbf16>, vector<256x64xbf16>, vector<128x64xf32> -> vector<128x64xf32>
    %c0_3 = arith.constant 0 : index
    %c0_4 = arith.constant 0 : index
    %3 = vector.load %arg3[%c0_3, %c0_4] : memref<1x64xf32, #tpu.memory_space<vmem>>, vector<1x64xf32>
    %4 = vector.broadcast %3 : vector<1x64xf32> to vector<128x64xf32>
    %5 = arith.addf %2, %4 : vector<128x64xf32>
    %cst_5 = arith.constant 0.000000e+00 : f32
    %6 = vector.broadcast %cst_5 : f32 to vector<128x64xf32>
    %7 = arith.maximumf %5, %6 : vector<128x64xf32>
    %8 = arith.truncf %7 : vector<128x64xf32> to vector<128x64xbf16>
    %c0_6 = arith.constant 0 : index
    %c0_7 = arith.constant 0 : index
    %9 = vector.load %arg4[%c0_6, %c0_7] : memref<128x64xbf16, #tpu.memory_space<vmem>>, vector<128x64xbf16>
    tpu.vector_store %arg4[%c0_6, %c0_7], %8 {strides = array<i32>} : memref<128x64xbf16, #tpu.memory_space<vmem>>, vector<128x64xbf16>,
    return
  }
  func.func @transform_0(%arg0: i32) -> (i32, i32) {
    %c0_i32 = arith.constant 0 : i32
    %c0_i32_0 = arith.constant 0 : i32
    return %arg0, %c0_i32 : i32, i32
  }
  func.func @transform_1(%arg0: i32) -> (i32, i32) {
    %c0_i32 = arith.constant 0 : i32
    %c0_i32_0 = arith.constant 0 : i32
    %c0_i32_1 = arith.constant 0 : i32
    return %c0_i32, %c0_i32_0 : i32, i32
  }
  func.func @transform_2(%arg0: i32) -> (i32, i32) {
    %c0_i32 = arith.constant 0 : i32
    %c0_i32_0 = arith.constant 0 : i32
    %c0_i32_1 = arith.constant 0 : i32
    return %c0_i32, %c0_i32_0 : i32, i32
  }
  func.func @transform_3(%arg0: i32) -> (i32, i32) {
    %c0_i32 = arith.constant 0 : i32
    %c0_i32_0 = arith.constant 0 : i32
    return %arg0, %c0_i32 : i32, i32
  }
}

module attributes {stable_mosaic.version = 11 : i64} {
  func.func @_conv_bn_relu_kernel(%arg0: i32, %arg1: memref<32x640xbf16, #tpu.memory_space<vmem>>, %arg2: memref<640x64xbf16, #tpu.memory_space<vmem>>, %arg3: memref<1x64xf32, #tpu.memory_space<vmem>>, %arg4: memref<32x64xbf16, #tpu.memory_space<vmem>>) attributes {dimension_semantics = [#tpu.dimension_semantics<parallel>], iteration_bounds = array<i64: 1>, scalar_prefetch = 0 : i64, scratch_operands = 0 : i64, tpu.core_type = #tpu.core_type<tc>, window_params = [{transform_indices = @transform_0, window_bounds = array<i64: 32, 640>}, {pipeline_mode = #tpu.pipeline_mode<synchronous>, transform_indices = @transform_1, window_bounds = array<i64: 640, 64>}, {pipeline_mode = #tpu.pipeline_mode<synchronous>, transform_indices = @transform_2, window_bounds = array<i64: 1, 64>}, {transform_indices = @transform_3, window_bounds = array<i64: 32, 64>}]} {
    %c0 = arith.constant 0 : index
    %c0_0 = arith.constant 0 : index
    %0 = vector.load %arg1[%c0, %c0_0] : memref<32x640xbf16, #tpu.memory_space<vmem>>, vector<32x640xbf16>
    %c0_1 = arith.constant 0 : index
    %c0_2 = arith.constant 0 : index
    %1 = vector.load %arg2[%c0_1, %c0_2] : memref<640x64xbf16, #tpu.memory_space<vmem>>, vector<640x64xbf16>
    %cst = arith.constant dense<0.000000e+00> : vector<32x64xf32>
    %2 = tpu.matmul %0, %1, %cst {dimension_numbers = #tpu.dot_dimension_numbers<[1], [0], [0], [1], [0, 0, 1, 1], [], []>} : vector<32x640xbf16>, vector<640x64xbf16>, vector<32x64xf32> -> vector<32x64xf32>
    %c0_3 = arith.constant 0 : index
    %c0_4 = arith.constant 0 : index
    %3 = vector.load %arg3[%c0_3, %c0_4] : memref<1x64xf32, #tpu.memory_space<vmem>>, vector<1x64xf32>
    %4 = vector.broadcast %3 : vector<1x64xf32> to vector<32x64xf32>
    %5 = arith.addf %2, %4 : vector<32x64xf32>
    %cst_5 = arith.constant 0.000000e+00 : f32
    %6 = vector.broadcast %cst_5 : f32 to vector<32x64xf32>
    %7 = arith.maximumf %5, %6 : vector<32x64xf32>
    %8 = arith.truncf %7 : vector<32x64xf32> to vector<32x64xbf16>
    %c0_6 = arith.constant 0 : index
    %c0_7 = arith.constant 0 : index
    %9 = vector.load %arg4[%c0_6, %c0_7] : memref<32x64xbf16, #tpu.memory_space<vmem>>, vector<32x64xbf16>
    tpu.vector_store %arg4[%c0_6, %c0_7], %8 {strides = array<i32>} : memref<32x64xbf16, #tpu.memory_space<vmem>>, vector<32x64xbf16>,
    return
  }
  func.func @transform_0(%arg0: i32) -> (i32, i32) {
    %c0_i32 = arith.constant 0 : i32
    %c0_i32_0 = arith.constant 0 : i32
    return %arg0, %c0_i32 : i32, i32
  }
  func.func @transform_1(%arg0: i32) -> (i32, i32) {
    %c0_i32 = arith.constant 0 : i32
    %c0_i32_0 = arith.constant 0 : i32
    %c0_i32_1 = arith.constant 0 : i32
    return %c0_i32, %c0_i32_0 : i32, i32
  }
  func.func @transform_2(%arg0: i32) -> (i32, i32) {
    %c0_i32 = arith.constant 0 : i32
    %c0_i32_0 = arith.constant 0 : i32
    %c0_i32_1 = arith.constant 0 : i32
    return %c0_i32, %c0_i32_0 : i32, i32
  }
  func.func @transform_3(%arg0: i32) -> (i32, i32) {
    %c0_i32 = arith.constant 0 : i32
    %c0_i32_0 = arith.constant 0 : i32
    return %arg0, %c0_i32 : i32, i32
  }
}

module attributes {stable_mosaic.version = 11 : i64} {
  func.func @_conv_bn_relu_x2_kernel(%arg0: i32, %arg1: memref<8x640xbf16, #tpu.memory_space<vmem>>, %arg2: memref<640x64xbf16, #tpu.memory_space<vmem>>, %arg3: memref<1x64xf32, #tpu.memory_space<vmem>>, %arg4: memref<64x128xbf16, #tpu.memory_space<vmem>>, %arg5: memref<1x128xf32, #tpu.memory_space<vmem>>, %arg6: memref<8x128xf32, #tpu.memory_space<vmem>>) attributes {dimension_semantics = [#tpu.dimension_semantics<parallel>], iteration_bounds = array<i64: 1>, scalar_prefetch = 0 : i64, scratch_operands = 0 : i64, tpu.core_type = #tpu.core_type<tc>, window_params = [{transform_indices = @transform_0, window_bounds = array<i64: 8, 640>}, {pipeline_mode = #tpu.pipeline_mode<synchronous>, transform_indices = @transform_1, window_bounds = array<i64: 640, 64>}, {pipeline_mode = #tpu.pipeline_mode<synchronous>, transform_indices = @transform_2, window_bounds = array<i64: 1, 64>}, {pipeline_mode = #tpu.pipeline_mode<synchronous>, transform_indices = @transform_3, window_bounds = array<i64: 64, 128>}, {pipeline_mode = #tpu.pipeline_mode<synchronous>, transform_indices = @transform_4, window_bounds = array<i64: 1, 128>}, {transform_indices = @transform_5, window_bounds = array<i64: 8, 128>}]} {
    %c0 = arith.constant 0 : index
    %c0_0 = arith.constant 0 : index
    %0 = vector.load %arg1[%c0, %c0_0] : memref<8x640xbf16, #tpu.memory_space<vmem>>, vector<8x640xbf16>
    %c0_1 = arith.constant 0 : index
    %c0_2 = arith.constant 0 : index
    %1 = vector.load %arg2[%c0_1, %c0_2] : memref<640x64xbf16, #tpu.memory_space<vmem>>, vector<640x64xbf16>
    %cst = arith.constant dense<0.000000e+00> : vector<8x64xf32>
    %2 = tpu.matmul %0, %1, %cst {dimension_numbers = #tpu.dot_dimension_numbers<[1], [0], [0], [1], [0, 0, 1, 1], [], []>} : vector<8x640xbf16>, vector<640x64xbf16>, vector<8x64xf32> -> vector<8x64xf32>
    %c0_3 = arith.constant 0 : index
    %c0_4 = arith.constant 0 : index
    %3 = vector.load %arg3[%c0_3, %c0_4] : memref<1x64xf32, #tpu.memory_space<vmem>>, vector<1x64xf32>
    %4 = vector.broadcast %3 : vector<1x64xf32> to vector<8x64xf32>
    %5 = arith.addf %2, %4 : vector<8x64xf32>
    %cst_5 = arith.constant 0.000000e+00 : f32
    %6 = vector.broadcast %cst_5 : f32 to vector<8x64xf32>
    %7 = arith.maximumf %5, %6 : vector<8x64xf32>
    %8 = arith.truncf %7 : vector<8x64xf32> to vector<8x64xbf16>
    %c0_6 = arith.constant 0 : index
    %c0_7 = arith.constant 0 : index
    %9 = vector.load %arg4[%c0_6, %c0_7] : memref<64x128xbf16, #tpu.memory_space<vmem>>, vector<64x128xbf16>
    %cst_8 = arith.constant dense<0.000000e+00> : vector<8x128xf32>
    %10 = tpu.matmul %8, %9, %cst_8 {dimension_numbers = #tpu.dot_dimension_numbers<[1], [0], [0], [1], [0, 0, 1, 1], [], []>} : vector<8x64xbf16>, vector<64x128xbf16>, vector<8x128xf32> -> vector<8x128xf32>
    %c0_9 = arith.constant 0 : index
    %c0_10 = arith.constant 0 : index
    %11 = vector.load %arg5[%c0_9, %c0_10] : memref<1x128xf32, #tpu.memory_space<vmem>>, vector<1x128xf32>
    %12 = vector.broadcast %11 : vector<1x128xf32> to vector<8x128xf32>
    %13 = arith.addf %10, %12 : vector<8x128xf32>
    %cst_11 = arith.constant 0.000000e+00 : f32
    %14 = vector.broadcast %cst_11 : f32 to vector<8x128xf32>
    %15 = arith.maximumf %13, %14 : vector<8x128xf32>
    %c0_12 = arith.constant 0 : index
    %c0_13 = arith.constant 0 : index
    %16 = vector.load %arg6[%c0_12, %c0_13] : memref<8x128xf32, #tpu.memory_space<vmem>>, vector<8x128xf32>
    tpu.vector_store %arg6[%c0_12, %c0_13], %15 {strides = array<i32>} : memref<8x128xf32, #tpu.memory_space<vmem>>, vector<8x128xf32>,
    return
  }
  func.func @transform_0(%arg0: i32) -> (i32, i32) {
    %c0_i32 = arith.constant 0 : i32
    %c0_i32_0 = arith.constant 0 : i32
    return %arg0, %c0_i32 : i32, i32
  }
  func.func @transform_1(%arg0: i32) -> (i32, i32) {
    %c0_i32 = arith.constant 0 : i32
    %c0_i32_0 = arith.constant 0 : i32
    %c0_i32_1 = arith.constant 0 : i32
    return %c0_i32, %c0_i32_0 : i32, i32
  }
  func.func @transform_2(%arg0: i32) -> (i32, i32) {
    %c0_i32 = arith.constant 0 : i32
    %c0_i32_0 = arith.constant 0 : i32
    %c0_i32_1 = arith.constant 0 : i32
    return %c0_i32, %c0_i32_0 : i32, i32
  }
  func.func @transform_3(%arg0: i32) -> (i32, i32) {
    %c0_i32 = arith.constant 0 : i32
    %c0_i32_0 = arith.constant 0 : i32
    %c0_i32_1 = arith.constant 0 : i32
    return %c0_i32, %c0_i32_0 : i32, i32
  }
  func.func @transform_4(%arg0: i32) -> (i32, i32) {
    %c0_i32 = arith.constant 0 : i32
    %c0_i32_0 = arith.constant 0 : i32
    %c0_i32_1 = arith.constant 0 : i32
    return %c0_i32, %c0_i32_0 : i32, i32
  }
  func.func @transform_5(%arg0: i32) -> (i32, i32) {
    %c0_i32 = arith.constant 0 : i32
    %c0_i32_0 = arith.constant 0 : i32
    return %arg0, %c0_i32 : i32, i32
  }
}

</mosaic_0001>

<bundles_post_ra>
// kernel: spatial_path_forward.3
= control target key start
LH: loop header
LB: loop body
LE: loop exit
PB: predicated region body
PF: predicated region fallthrough
CT: control target
= control target key end

     0   :  { %vm372_vm0 = vcmask 519168   ;;  %s819_s1 = inlined_call_operand.vmem [shape: bf16[256,64], index: 1, kind: input, shape index: {}]   ;;  %s820_s2 = inlined_call_operand.vmem [shape: f32[1,64], index: 2, kind: input, shape index: {}]   ;;  %s821_s0 = inlined_call_operand.vmem [shape: bf16[128,256], index: 0, kind: input, shape index: {}]   ;;  %s822_s3 = inlined_call_operand.vmem [shape: bf16[128,64], index: 3, kind: output, shape index: {}]  }
   0x1   :  { %v544_v0 = vld [vmem:[%s819_s1 + $0x38] sm:$0xff]  ;;  %v543_v2 = vld [vmem:[%s819_s1 + $0x30] sm:$0xff]  ;;  %v542_v4 = vld [vmem:[%s819_s1 + $0x28] sm:$0xff] }
   0x2   :  { %v552_v1 = vld [vmem:[%s819_s1 + $0x78] sm:$0xff]  ;;  %242 = vmatpush.bf16.msra.mxu0 %v544_v0  ;;  %553 = vmatpush.bf16.msra.mxu2 %v544_v0  ;;  %v551_v3 = vld [vmem:[%s819_s1 + $0x70] sm:$0xff]  ;;  %v550_v5 = vld [vmem:[%s819_s1 + $0x68] sm:$0xff] }
   0x3   :  { %291 = vmatpush.bf16.msra.mxu1 %v552_v1  ;;  %561 = vmatpush.bf16.msra.mxu3 %v552_v1  ;;  %v541_v6 = vld [vmem:[%s819_s1 + $0x20] sm:$0xff]  ;;  %v540_v8 = vld [vmem:[%s819_s1 + $0x18] sm:$0xff]  ;;  %v539_v10 = vld [vmem:[%s819_s1 + $0x10] sm:$0xff] }
   0x4   :  { %v549_v7 = vld [vmem:[%s819_s1 + $0x60] sm:$0xff]  ;;  %v548_v9 = vld [vmem:[%s819_s1 + $0x58] sm:$0xff]  ;;  %v547_v11 = vld [vmem:[%s819_s1 + $0x50] sm:$0xff] }
   0x5   :  { %v538_v12 = vld [vmem:[%s819_s1 + $0x8] sm:$0xff]  ;;  %v537_v14 = vld [vmem:[%s819_s1] sm:$0xff]  ;;  %v403_v28 = vld [vmem:[%s821_s0 + $0x10] sm:$0xf] }
   0x6   :  { %243 = vmatpush.bf16.msra.mxu0 %v543_v2  ;;  %554 = vmatpush.bf16.msra.mxu2 %v543_v2  ;;  %v546_v13 = vld [vmem:[%s819_s1 + $0x48] sm:$0xff]  ;;  %v545_v15 = vld [vmem:[%s819_s1 + $0x40] sm:$0xff]  ;;  %v524_v29 = vld [vmem:[%s821_s0 + $0x14] sm:$0xf0] }
   0x7   :  { %292 = vmatpush.bf16.msra.mxu1 %v551_v3  ;;  %562 = vmatpush.bf16.msra.mxu3 %v551_v3  ;;  %v395_v16 = vld [vmem:[%s821_s0] sm:$0xf]  ;;  %v522_v17 = vld [vmem:[%s821_s0 + $0x4] sm:$0xf0]  ;;  %v521_v20 = vld [vmem:[%s821_s0 + $0x4] sm:$0xf]  ;;  %v404_v36 = vor.u32 %v524_v29, %v403_v28 }
   0x8   :  { %v427_v18 = vld [vmem:[%s821_s0 + $0x40] sm:$0xf]  ;;  %v530_v19 = vld [vmem:[%s821_s0 + $0x44] sm:$0xf0]  ;;  %v397_v21 = vld [vmem:[%s821_s0 + $0x8] sm:$0xf0]  ;;  %v396_v24 = vor.u32 %v522_v17, %v395_v16 }
   0x9   :  { %v529_v22 = vld [vmem:[%s821_s0 + $0x44] sm:$0xf]  ;;  %v429_v23 = vld [vmem:[%s821_s0 + $0x48] sm:$0xf0]  ;;  %v428_v25 = vor.u32 %v530_v19, %v427_v18  ;;  %v400_v26 = vor.u32 %v521_v20, %v397_v21  ;;  %v435_v30 = vld [vmem:[%s821_s0 + $0x50] sm:$0xf] }
   0xa   :  { %244 = vmatpush.bf16.msra.mxu0 %v542_v4  ;;  %555 = vmatpush.bf16.msra.mxu2 %v542_v4  ;;  %v432_v27 = vor.u32 %v529_v22, %v429_v23  ;;  %v532_v31 = vld [vmem:[%s821_s0 + $0x54] sm:$0xf0]  ;;  %v523_v32 = vld [vmem:[%s821_s0 + $0x14] sm:$0xf]  ;;  %v405_v33 = vld [vmem:[%s821_s0 + $0x18] sm:$0xf0] }
   0xb   :  { %293 = vmatpush.bf16.msra.mxu1 %v550_v5  ;;  %563 = vmatpush.bf16.msra.mxu3 %v550_v5  ;;  %v531_v34 = vld [vmem:[%s821_s0 + $0x54] sm:$0xf]  ;;  %v437_v35 = vld [vmem:[%s821_s0 + $0x58] sm:$0xf0]  ;;  %v436_v37 = vor.u32 %v532_v31, %v435_v30  ;;  %v408_v38 = vor.u32 %v523_v32, %v405_v33  ;;  %v411_v40 = vld [vmem:[%s821_s0 + $0x20] sm:$0xf] }
   0xc   :  { %v440_v39 = vor.u32 %v531_v34, %v437_v35  ;;  %v526_v41 = vld [vmem:[%s821_s0 + $0x24] sm:$0xf0]  ;;  %v443_v42 = vld [vmem:[%s821_s0 + $0x60] sm:$0xf]  ;;  %v525_v44 = vld [vmem:[%s821_s0 + $0x24] sm:$0xf] }
   0xd   :  { %v534_v43 = vld [vmem:[%s821_s0 + $0x64] sm:$0xf0]  ;;  %v413_v45 = vld [vmem:[%s821_s0 + $0x28] sm:$0xf0]  ;;  %v533_v46 = vld [vmem:[%s821_s0 + $0x64] sm:$0xf]  ;;  %v412_v48 = vor.u32 %v526_v41, %v411_v40 }
   0xe   :  { %245 = vmatpush.bf16.msra.mxu0 %v541_v6  ;;  %556 = vmatpush.bf16.msra.mxu2 %v541_v6  ;;  %v445_v47 = vld [vmem:[%s821_s0 + $0x68] sm:$0xf0]  ;;  %v444_v49 = vor.u32 %v534_v43, %v443_v42  ;;  %v416_v50 = vor.u32 %v525_v44, %v413_v45  ;;  %v419_v52 = vld [vmem:[%s821_s0 + $0x30] sm:$0xf]  ;;  %v528_v53 = vld [vmem:[%s821_s0 + $0x34] sm:$0xf0] }
   0xf   :  { %294 = vmatpush.bf16.msra.mxu1 %v549_v7  ;;  %564 = vmatpush.bf16.msra.mxu3 %v549_v7  ;;  %v448_v51 = vor.u32 %v533_v46, %v445_v47  ;;  %v451_v54 = vld [vmem:[%s821_s0 + $0x70] sm:$0xf]  ;;  %v536_v55 = vld [vmem:[%s821_s0 + $0x74] sm:$0xf0]  ;;  %v527_v56 = vld [vmem:[%s821_s0 + $0x34] sm:$0xf]  ;;  %v420_v60 = vor.u32 %v528_v53, %v419_v52 }
  0x10   :  { %v421_v57 = vld [vmem:[%s821_s0 + $0x38] sm:$0xf0]  ;;  %v535_v58 = vld [vmem:[%s821_s0 + $0x74] sm:$0xf]  ;;  %v452_v61 = vor.u32 %v536_v55, %v451_v54  ;;  %v737_v0 = vld [vmem:[%s820_s2] ss:$0 sm:$0xff] }
  0x11   :  { %v453_v59 = vld [vmem:[%s821_s0 + $0x78] sm:$0xf0]  ;;  %v424_v62 = vor.u32 %v527_v56, %v421_v57 }
  0x12   :  { %246 = vmatpush.bf16.msra.mxu0 %v540_v8  ;;  %557 = vmatpush.bf16.msra.mxu2 %v540_v8  ;;  %v456_v63 = vor.u32 %v535_v58, %v453_v59 }
  0x13   :  { %295 = vmatpush.bf16.msra.mxu1 %v548_v9  ;;  %565 = vmatpush.bf16.msra.mxu3 %v548_v9 }
  0x16   :  { %247 = vmatpush.bf16.msra.mxu0 %v539_v10  ;;  %558 = vmatpush.bf16.msra.mxu2 %v539_v10 }
  0x17   :  { %296 = vmatpush.bf16.msra.mxu1 %v547_v11  ;;  %566 = vmatpush.bf16.msra.mxu3 %v547_v11 }
  0x1a   :  { %248 = vmatpush.bf16.msra.mxu0 %v538_v12  ;;  %559 = vmatpush.bf16.msra.mxu2 %v538_v12 }
  0x1b   :  { %297 = vmatpush.bf16.msra.mxu1 %v546_v13  ;;  %567 = vmatpush.bf16.msra.mxu3 %v546_v13 }
  0x1e   :  { %249 = vmatpush.bf16.msra.mxu0 %v537_v14  ;;  %560 = vmatpush.bf16.msra.mxu2 %v537_v14 }
  0x1f   :  { %298 = vmatpush.bf16.msra.mxu1 %v545_v15  ;;  %568 = vmatpush.bf16.msra.mxu3 %v545_v15 }
  0x21   :  { %250 = vmatmul.bf16.vlgmr.msra.gmra.mxu0 %v396_v24  ;;  %270 = vmatmul.bf16.vlgmr.msra.gmra.mxu2 %v428_v25 }
  0x22   :  { %299 = vmatmul.bf16.vlgmr.msra.gmra.mxu1 %v400_v26  ;;  %319 = vmatmul.bf16.vlgmr.msra.gmra.mxu3 %v432_v27 }
  0x31   :  { %255 = vmatmul.bf16.gmra.mxu0 %v404_v36  ;;  %275 = vmatmul.bf16.gmra.mxu2 %v436_v37 }
  0x32   :  { %304 = vmatmul.bf16.gmra.mxu1 %v408_v38  ;;  %324 = vmatmul.bf16.gmra.mxu3 %v440_v39 }
  0x41   :  { %260 = vmatmul.bf16.gmra.mxu0 %v412_v48  ;;  %280 = vmatmul.bf16.gmra.mxu2 %v444_v49 }
  0x42   :  { %309 = vmatmul.bf16.gmra.mxu1 %v416_v50  ;;  %329 = vmatmul.bf16.gmra.mxu3 %v448_v51 }
  0x51   :  { %265 = vmatmul.bf16.gmra.mxu0 %v420_v60  ;;  %285 = vmatmul.bf16.gmra.mxu2 %v452_v61 }
  0x52   :  { %314 = vmatmul.bf16.gmra.mxu1 %v424_v62  ;;  %334 = vmatmul.bf16.gmra.mxu3 %v456_v63 }
  0x9e   :  { %v251_v1 = vpop.f32.mrf.mxu0 }
  0x9f   :  { %v252_v2 = vadd.f32 %v737_v0, %v251_v1  ;;  %v300_v3 = vpop.f32.mrf.mxu1 }
  0xa1   :  { %v301_v4 = vadd.f32 %v300_v3, %v252_v2 }
  0xa3   :  { %v340_v5 = vmax.f32 %v301_v4, 0.0 }
  0xa4   :  { %v271_v6 = vpop.f32.mrf.mxu2 }
  0xa5   :  { %v356_v7 = vpack.c.bf16 %v340_v5, %v340_v5  ;;  %v272_v8 = vadd.f32 %v737_v0, %v271_v6  ;;  %v320_v9 = vpop.f32.mrf.mxu3 }
  0xa6   :  { %v253_v10 = vpop.f32.mrf.mxu0 }
  0xa7   :  { %373 = vst.msk [vmem:[%s822_s3] sm:$0xf] %vm372_vm0, %v356_v7  ;;  %v321_v11 = vadd.f32 %v320_v9, %v272_v8  ;;  %v254_v12 = vadd.f32 %v737_v0, %v253_v10  ;;  %v302_v13 = vpop.f32.mrf.mxu1 }
  0xa9   :  { %v348_v14 = vmax.f32 %v321_v11, 0.0  ;;  %v303_v15 = vadd.f32 %v302_v13, %v254_v12 }
  0xab   :  { %v364_v16 = vpack.c.bf16 %v348_v14, %v348_v14  ;;  %v341_v17 = vmax.f32 %v303_v15, 0.0 }
  0xac   :  { %v273_v18 = vpop.f32.mrf.mxu2 }
  0xad   :  { %381 = vst.msk [vmem:[%s822_s3 + $0x20] sm:$0xf] %vm372_vm0, %v364_v16  ;;  %v357_v19 = vpack.c.bf16 %v341_v17, %v341_v17  ;;  %v274_v20 = vadd.f32 %v737_v0, %v273_v18  ;;  %v322_v21 = vpop.f32.mrf.mxu3 }
  0xae   :  { %v256_v22 = vpop.f32.mrf.mxu0 }
  0xaf   :  { %374 = vst.msk [vmem:[%s822_s3 + $0x4] sm:$0xf] %vm372_vm0, %v357_v19  ;;  %v323_v23 = vadd.f32 %v322_v21, %v274_v20  ;;  %v257_v24 = vadd.f32 %v737_v0, %v256_v22  ;;  %v305_v25 = vpop.f32.mrf.mxu1 }
  0xb1   :  { %v349_v26 = vmax.f32 %v323_v23, 0.0  ;;  %v306_v27 = vadd.f32 %v305_v25, %v257_v24 }
  0xb3   :  { %v365_v28 = vpack.c.bf16 %v349_v26, %v349_v26  ;;  %v342_v29 = vmax.f32 %v306_v27, 0.0 }
  0xb4   :  { %v276_v30 = vpop.f32.mrf.mxu2 }
  0xb5   :  { %382 = vst.msk [vmem:[%s822_s3 + $0x24] sm:$0xf] %vm372_vm0, %v365_v28  ;;  %v358_v31 = vpack.c.bf16 %v342_v29, %v342_v29  ;;  %v277_v32 = vadd.f32 %v737_v0, %v276_v30  ;;  %v325_v33 = vpop.f32.mrf.mxu3 }
  0xb6   :  { %v258_v34 = vpop.f32.mrf.mxu0 }
  0xb7   :  { %375 = vst.msk [vmem:[%s822_s3 + $0x8] sm:$0xf] %vm372_vm0, %v358_v31  ;;  %v326_v35 = vadd.f32 %v325_v33, %v277_v32  ;;  %v259_v36 = vadd.f32 %v737_v0, %v258_v34  ;;  %v307_v37 = vpop.f32.mrf.mxu1 }
  0xb9   :  { %v350_v38 = vmax.f32 %v326_v35, 0.0  ;;  %v308_v39 = vadd.f32 %v307_v37, %v259_v36 }
  0xbb   :  { %v366_v40 = vpack.c.bf16 %v350_v38, %v350_v38  ;;  %v343_v41 = vmax.f32 %v308_v39, 0.0 }
  0xbc   :  { %v278_v42 = vpop.f32.mrf.mxu2 }
  0xbd   :  { %383 = vst.msk [vmem:[%s822_s3 + $0x28] sm:$0xf] %vm372_vm0, %v366_v40  ;;  %v359_v43 = vpack.c.bf16 %v343_v41, %v343_v41  ;;  %v279_v44 = vadd.f32 %v737_v0, %v278_v42  ;;  %v327_v45 = vpop.f32.mrf.mxu3 }
  0xbe   :  { %v261_v46 = vpop.f32.mrf.mxu0 }
  0xbf   :  { %376 = vst.msk [vmem:[%s822_s3 + $0xc] sm:$0xf] %vm372_vm0, %v359_v43  ;;  %v328_v47 = vadd.f32 %v327_v45, %v279_v44  ;;  %v262_v48 = vadd.f32 %v737_v0, %v261_v46  ;;  %v310_v49 = vpop.f32.mrf.mxu1 }
  0xc1   :  { %v351_v50 = vmax.f32 %v328_v47, 0.0  ;;  %v311_v51 = vadd.f32 %v310_v49, %v262_v48 }
  0xc3   :  { %v367_v52 = vpack.c.bf16 %v351_v50, %v351_v50  ;;  %v344_v53 = vmax.f32 %v311_v51, 0.0 }
  0xc4   :  { %v281_v54 = vpop.f32.mrf.mxu2 }
  0xc5   :  { %384 = vst.msk [vmem:[%s822_s3 + $0x2c] sm:$0xf] %vm372_vm0, %v367_v52  ;;  %v360_v55 = vpack.c.bf16 %v344_v53, %v344_v53  ;;  %v282_v56 = vadd.f32 %v737_v0, %v281_v54  ;;  %v330_v57 = vpop.f32.mrf.mxu3 }
  0xc6   :  { %v263_v58 = vpop.f32.mrf.mxu0 }
  0xc7   :  { %377 = vst.msk [vmem:[%s822_s3 + $0x10] sm:$0xf] %vm372_vm0, %v360_v55  ;;  %v331_v59 = vadd.f32 %v330_v57, %v282_v56  ;;  %v264_v60 = vadd.f32 %v737_v0, %v263_v58  ;;  %v312_v61 = vpop.f32.mrf.mxu1 }
  0xc9   :  { %v352_v62 = vmax.f32 %v331_v59, 0.0  ;;  %v313_v63 = vadd.f32 %v312_v61, %v264_v60 }
  0xcb   :  { %v368_v1 = vpack.c.bf16 %v352_v62, %v352_v62  ;;  %v345_v2 = vmax.f32 %v313_v63, 0.0 }
  0xcc   :  { %v283_v3 = vpop.f32.mrf.mxu2 }
  0xcd   :  { %385 = vst.msk [vmem:[%s822_s3 + $0x30] sm:$0xf] %vm372_vm0, %v368_v1  ;;  %v361_v4 = vpack.c.bf16 %v345_v2, %v345_v2  ;;  %v284_v5 = vadd.f32 %v737_v0, %v283_v3  ;;  %v332_v6 = vpop.f32.mrf.mxu3 }
  0xce   :  { %v266_v7 = vpop.f32.mrf.mxu0 }
  0xcf   :  { %378 = vst.msk [vmem:[%s822_s3 + $0x14] sm:$0xf] %vm372_vm0, %v361_v4  ;;  %v333_v8 = vadd.f32 %v332_v6, %v284_v5  ;;  %v267_v9 = vadd.f32 %v737_v0, %v266_v7  ;;  %v315_v10 = vpop.f32.mrf.mxu1 }
  0xd1   :  { %v353_v11 = vmax.f32 %v333_v8, 0.0  ;;  %v316_v12 = vadd.f32 %v315_v10, %v267_v9 }
  0xd3   :  { %v369_v13 = vpack.c.bf16 %v353_v11, %v353_v11  ;;  %v346_v14 = vmax.f32 %v316_v12, 0.0 }
  0xd4   :  { %v286_v15 = vpop.f32.mrf.mxu2 }
  0xd5   :  { %386 = vst.msk [vmem:[%s822_s3 + $0x34] sm:$0xf] %vm372_vm0, %v369_v13  ;;  %v362_v16 = vpack.c.bf16 %v346_v14, %v346_v14  ;;  %v287_v17 = vadd.f32 %v737_v0, %v286_v15  ;;  %v335_v18 = vpop.f32.mrf.mxu3 }
  0xd6   :  { %v268_v19 = vpop.f32.mrf.mxu0 }
  0xd7   :  { %379 = vst.msk [vmem:[%s822_s3 + $0x18] sm:$0xf] %vm372_vm0, %v362_v16  ;;  %v336_v20 = vadd.f32 %v335_v18, %v287_v17  ;;  %v269_v21 = vadd.f32 %v737_v0, %v268_v19  ;;  %v317_v22 = vpop.f32.mrf.mxu1 }
  0xd9   :  { %v354_v23 = vmax.f32 %v336_v20, 0.0  ;;  %v318_v24 = vadd.f32 %v317_v22, %v269_v21 }
  0xdb   :  { %v370_v25 = vpack.c.bf16 %v354_v23, %v354_v23  ;;  %v347_v26 = vmax.f32 %v318_v24, 0.0 }
  0xdc   :  { %v288_v27 = vpop.f32.mrf.mxu2 }
  0xdd   :  { %387 = vst.msk [vmem:[%s822_s3 + $0x38] sm:$0xf] %vm372_vm0, %v370_v25  ;;  %v363_v28 = vpack.c.bf16 %v347_v26, %v347_v26  ;;  %v289_v29 = vadd.f32 %v737_v0, %v288_v27  ;;  %v337_v30 = vpop.f32.mrf.mxu3 }
  0xdf   :  { %380 = vst.msk [vmem:[%s822_s3 + $0x1c] sm:$0xf] %vm372_vm0, %v363_v28  ;;  %v338_v31 = vadd.f32 %v337_v30, %v289_v29 }
  0xe1   :  { %v355_v32 = vmax.f32 %v338_v31, 0.0 }
  0xe3   :  { %v371_v33 = vpack.c.bf16 %v355_v32, %v355_v32 }
  0xe5   :  { %388 = vst.msk [vmem:[%s822_s3 + $0x3c] sm:$0xf] %vm372_vm0, %v371_v33 }

// kernel: spatial_path_forward.4
= control target key start
LH: loop header
LB: loop body
LE: loop exit
PB: predicated region body
PF: predicated region fallthrough
CT: control target
= control target key end

     0   :  { %vm505_vm0 = vcmask 519168   ;;  %s992_s1 = inlined_call_operand.vmem [shape: bf16[640,64], index: 1, kind: input, shape index: {}]   ;;  %s993_s2 = inlined_call_operand.vmem [shape: f32[1,64], index: 2, kind: input, shape index: {}]   ;;  %s994_s0 = inlined_call_operand.vmem [shape: bf16[32,640], index: 0, kind: input, shape index: {}]   ;;  %s995_s3 = inlined_call_operand.vmem [shape: bf16[32,64], index: 3, kind: output, shape index: {}]  }
   0x1   :  { %v731_v0 = vld [vmem:[%s992_s1 + $0x38] sm:$0xff]  ;;  %v730_v4 = vld [vmem:[%s992_s1 + $0x30] sm:$0xff]  ;;  %v729_v8 = vld [vmem:[%s992_s1 + $0x28] sm:$0xff] }
   0x2   :  { %v739_v1 = vld [vmem:[%s992_s1 + $0x78] sm:$0xff]  ;;  %402 = vmatpush.bf16.msra.mxu0 %v731_v0  ;;  %v738_v5 = vld [vmem:[%s992_s1 + $0x70] sm:$0xff]  ;;  %v737_v9 = vld [vmem:[%s992_s1 + $0x68] sm:$0xff] }
   0x3   :  { %v747_v2 = vld [vmem:[%s992_s1 + $0xb8] sm:$0xff]  ;;  %421 = vmatpush.bf16.msra.mxu1 %v739_v1  ;;  %v746_v6 = vld [vmem:[%s992_s1 + $0xb0] sm:$0xff]  ;;  %v745_v10 = vld [vmem:[%s992_s1 + $0xa8] sm:$0xff] }
   0x4   :  { %v755_v3 = vld [vmem:[%s992_s1 + $0xf8] sm:$0xff]  ;;  %440 = vmatpush.bf16.msra.mxu2 %v747_v2  ;;  %v754_v7 = vld [vmem:[%s992_s1 + $0xf0] sm:$0xff]  ;;  %v753_v11 = vld [vmem:[%s992_s1 + $0xe8] sm:$0xff] }
   0x5   :  { %459 = vmatpush.bf16.msra.mxu3 %v755_v3  ;;  %v728_v12 = vld [vmem:[%s992_s1 + $0x20] sm:$0xff]  ;;  %v727_v16 = vld [vmem:[%s992_s1 + $0x18] sm:$0xff]  ;;  %v726_v20 = vld [vmem:[%s992_s1 + $0x10] sm:$0xff] }
   0x6   :  { %403 = vmatpush.bf16.msra.mxu0 %v730_v4  ;;  %v736_v13 = vld [vmem:[%s992_s1 + $0x60] sm:$0xff]  ;;  %v735_v17 = vld [vmem:[%s992_s1 + $0x58] sm:$0xff]  ;;  %v734_v21 = vld [vmem:[%s992_s1 + $0x50] sm:$0xff] }
   0x7   :  { %422 = vmatpush.bf16.msra.mxu1 %v738_v5  ;;  %v744_v14 = vld [vmem:[%s992_s1 + $0xa0] sm:$0xff]  ;;  %v743_v18 = vld [vmem:[%s992_s1 + $0x98] sm:$0xff]  ;;  %v742_v22 = vld [vmem:[%s992_s1 + $0x90] sm:$0xff] }
   0x8   :  { %441 = vmatpush.bf16.msra.mxu2 %v746_v6  ;;  %v752_v15 = vld [vmem:[%s992_s1 + $0xe0] sm:$0xff]  ;;  %v751_v19 = vld [vmem:[%s992_s1 + $0xd8] sm:$0xff]  ;;  %v750_v23 = vld [vmem:[%s992_s1 + $0xd0] sm:$0xff] }
   0x9   :  { %460 = vmatpush.bf16.msra.mxu3 %v754_v7  ;;  %v725_v24 = vld [vmem:[%s992_s1 + $0x8] sm:$0xff]  ;;  %v724_v28 = vld [vmem:[%s992_s1] sm:$0xff]  ;;  %v716_v33 = vld [vmem:[%s994_s0 + $0x10] sm:$0xf0] }
   0xa   :  { %404 = vmatpush.bf16.msra.mxu0 %v729_v8  ;;  %v733_v25 = vld [vmem:[%s992_s1 + $0x48] sm:$0xff]  ;;  %v732_v29 = vld [vmem:[%s992_s1 + $0x40] sm:$0xff]  ;;  %v518_v35 = vld [vmem:[%s994_s0 + $0x14] sm:$0xf0] }
   0xb   :  { %423 = vmatpush.bf16.msra.mxu1 %v737_v9  ;;  %v741_v26 = vld [vmem:[%s992_s1 + $0x88] sm:$0xff]  ;;  %v740_v30 = vld [vmem:[%s992_s1 + $0x80] sm:$0xff]  ;;  %v717_v37 = vld [vmem:[%s994_s0 + $0x18] sm:$0xf0] }
   0xc   :  { %442 = vmatpush.bf16.msra.mxu2 %v745_v10  ;;  %v749_v27 = vld [vmem:[%s992_s1 + $0xc8] sm:$0xff]  ;;  %v748_v31 = vld [vmem:[%s992_s1 + $0xc0] sm:$0xff]  ;;  %v763_v40 = vld [vmem:[%s992_s1 + $0x138] sm:$0xff] }
   0xd   :  { %461 = vmatpush.bf16.msra.mxu3 %v753_v11  ;;  %v516_v32 = vld [vmem:[%s994_s0] sm:$0xf]  ;;  %v714_v34 = vld [vmem:[%s994_s0 + $0x4] sm:$0xf]  ;;  %v524_v36 = vld [vmem:[%s994_s0 + $0x8] sm:$0xf] }
   0xe   :  { %405 = vmatpush.bf16.msra.mxu0 %v728_v12  ;;  %v715_v38 = vld [vmem:[%s994_s0 + $0xc] sm:$0xf]  ;;  %v526_v39 = vld [vmem:[%s994_s0 + $0x1c] sm:$0xf0]  ;;  %v517_v41 = vor.u32 %v716_v33, %v516_v32  ;;  %v521_v42 = vor.u32 %v714_v34, %v518_v35  ;;  %v525_v43 = vor.u32 %v717_v37, %v524_v36  ;;  %v762_v45 = vld [vmem:[%s992_s1 + $0x130] sm:$0xff] }
   0xf   :  { %424 = vmatpush.bf16.msra.mxu1 %v736_v13  ;;  %v529_v44 = vor.u32 %v715_v38, %v526_v39  ;;  %v761_v46 = vld [vmem:[%s992_s1 + $0x128] sm:$0xff]  ;;  %v760_v47 = vld [vmem:[%s992_s1 + $0x120] sm:$0xff]  ;;  %v721_v49 = vld [vmem:[%s994_s0 + $0x38] sm:$0xf0] }
  0x10   :  { %443 = vmatpush.bf16.msra.mxu2 %v744_v14  ;;  %v536_v48 = vld [vmem:[%s994_s0 + $0x28] sm:$0xf]  ;;  %v719_v50 = vld [vmem:[%s994_s0 + $0x2c] sm:$0xf]  ;;  %v538_v51 = vld [vmem:[%s994_s0 + $0x3c] sm:$0xf0] }
  0x11   :  { %462 = vmatpush.bf16.msra.mxu3 %v752_v15  ;;  %v544_v52 = vld [vmem:[%s994_s0 + $0x30] sm:$0xf]  ;;  %v722_v53 = vld [vmem:[%s994_s0 + $0x40] sm:$0xf0]  ;;  %v720_v54 = vld [vmem:[%s994_s0 + $0x34] sm:$0xf]  ;;  %v537_v57 = vor.u32 %v721_v49, %v536_v48  ;;  %v541_v58 = vor.u32 %v719_v50, %v538_v51 }
  0x12   :  { %406 = vmatpush.bf16.msra.mxu0 %v727_v16  ;;  %v546_v55 = vld [vmem:[%s994_s0 + $0x44] sm:$0xf0]  ;;  %v759_v56 = vld [vmem:[%s992_s1 + $0x118] sm:$0xff]  ;;  %v545_v59 = vor.u32 %v722_v53, %v544_v52  ;;  %v758_v61 = vld [vmem:[%s992_s1 + $0x110] sm:$0xff] }
  0x13   :  { %425 = vmatpush.bf16.msra.mxu1 %v735_v17  ;;  %v549_v60 = vor.u32 %v720_v54, %v546_v55  ;;  %v757_v62 = vld [vmem:[%s992_s1 + $0x108] sm:$0xff]  ;;  %v756_v63 = vld [vmem:[%s992_s1 + $0x100] sm:$0xff]  ;;  %v532_v0 = vld [vmem:[%s994_s0 + $0x10] sm:$0xf] }
  0x14   :  { %444 = vmatpush.bf16.msra.mxu2 %v743_v18  ;;  %v718_v1 = vld [vmem:[%s994_s0 + $0x20] sm:$0xf0]  ;;  %v552_v2 = vld [vmem:[%s994_s0 + $0x38] sm:$0xf]  ;;  %v723_v3 = vld [vmem:[%s994_s0 + $0x48] sm:$0xf0] }
  0x15   :  { %463 = vmatpush.bf16.msra.mxu3 %v751_v19  ;;  %v533_v4 = vor.u32 %v718_v1, %v532_v0  ;;  %v553_v5 = vor.u32 %v723_v3, %v552_v2  ;;  %v772_v15 = vld [vmem:[%s993_s2] ss:$0 sm:$0xff] }
  0x16   :  { %407 = vmatpush.bf16.msra.mxu0 %v726_v20 }
  0x17   :  { %426 = vmatpush.bf16.msra.mxu1 %v734_v21 }
  0x18   :  { %445 = vmatpush.bf16.msra.mxu2 %v742_v22 }
  0x19   :  { %464 = vmatpush.bf16.msra.mxu3 %v750_v23 }
  0x1a   :  { %408 = vmatpush.bf16.msra.mxu0 %v725_v24 }
  0x1b   :  { %427 = vmatpush.bf16.msra.mxu1 %v733_v25 }
  0x1c   :  { %446 = vmatpush.bf16.msra.mxu2 %v741_v26 }
  0x1d   :  { %465 = vmatpush.bf16.msra.mxu3 %v749_v27 }
  0x1e   :  { %409 = vmatpush.bf16.msra.mxu0 %v724_v28 }
  0x1f   :  { %428 = vmatpush.bf16.msra.mxu1 %v732_v29 }
  0x20   :  { %447 = vmatpush.bf16.msra.mxu2 %v740_v30 }
  0x21   :  { %466 = vmatpush.bf16.msra.mxu3 %v748_v31  ;;  %410 = vmatmul.bf16.vlgmr.msra.gmra.mxu0 %v517_v41 }
  0x22   :  { %478 = vmatpush.bf16.msrb.mxu0 %v763_v40  ;;  %429 = vmatmul.bf16.vlgmr.msra.gmra.mxu1 %v521_v42 }
  0x23   :  { %764 = vmatpush.bf16.msrb.mxu1 %v763_v40  ;;  %448 = vmatmul.bf16.vlgmr.msra.gmra.mxu2 %v525_v43 }
  0x24   :  { %467 = vmatmul.bf16.vlgmr.msra.gmra.mxu3 %v529_v44 }
  0x26   :  { %479 = vmatpush.bf16.msrb.mxu0 %v762_v45 }
  0x27   :  { %765 = vmatpush.bf16.msrb.mxu1 %v762_v45 }
  0x2a   :  { %480 = vmatpush.bf16.msrb.mxu0 %v761_v46 }
  0x2b   :  { %766 = vmatpush.bf16.msrb.mxu1 %v761_v46 }
  0x2e   :  { %481 = vmatpush.bf16.msrb.mxu0 %v760_v47 }
  0x2f   :  { %767 = vmatpush.bf16.msrb.mxu1 %v760_v47 }
  0x31   :  { %415 = vmatmul.bf16.gmra.mxu0 %v537_v57 }
  0x32   :  { %482 = vmatpush.bf16.msrb.mxu0 %v759_v56  ;;  %434 = vmatmul.bf16.gmra.mxu1 %v541_v58 }
  0x33   :  { %768 = vmatpush.bf16.msrb.mxu1 %v759_v56  ;;  %453 = vmatmul.bf16.gmra.mxu2 %v545_v59 }
  0x34   :  { %472 = vmatmul.bf16.gmra.mxu3 %v549_v60 }
  0x36   :  { %483 = vmatpush.bf16.msrb.mxu0 %v758_v61 }
  0x37   :  { %769 = vmatpush.bf16.msrb.mxu1 %v758_v61 }
  0x3a   :  { %484 = vmatpush.bf16.msrb.mxu0 %v757_v62 }
  0x3b   :  { %770 = vmatpush.bf16.msrb.mxu1 %v757_v62 }
  0x3e   :  { %485 = vmatpush.bf16.msrb.mxu0 %v756_v63 }
  0x3f   :  { %771 = vmatpush.bf16.msrb.mxu1 %v756_v63 }
  0x41   :  { %486 = vmatmul.bf16.vlgmr.msrb.gmra.mxu0 %v533_v4 }
  0x42   :  { %491 = vmatmul.bf16.vlgmr.msrb.gmra.mxu1 %v553_v5 }
  0x9e   :  { %v411_v6 = vpop.f32.mrf.mxu0 }
  0x9f   :  { %v430_v7 = vpop.f32.mrf.mxu1  ;;  %v412_v17 = vadd.f32 %v772_v15, %v411_v6 }
  0xa1   :  { %v431_v22 = vadd.f32 %v430_v7, %v412_v17 }
  0xa6   :  { %v449_v8 = vpop.f32.mrf.mxu2  ;;  %v413_v10 = vpop.f32.mrf.mxu0 }
  0xa7   :  { %v468_v9 = vpop.f32.mrf.mxu3  ;;  %v432_v11 = vpop.f32.mrf.mxu1  ;;  %v450_v24 = vadd.f32 %v449_v8, %v431_v22  ;;  %v414_v27 = vadd.f32 %v772_v15, %v413_v10 }
  0xa9   :  { %v469_v29 = vadd.f32 %v468_v9, %v450_v24  ;;  %v433_v34 = vadd.f32 %v432_v11, %v414_v27 }
  0xae   :  { %v451_v12 = vpop.f32.mrf.mxu2  ;;  %v416_v13 = vpop.f32.mrf.mxu0 }
  0xaf   :  { %v435_v14 = vpop.f32.mrf.mxu1  ;;  %v470_v16 = vpop.f32.mrf.mxu3  ;;  %v417_v18 = vadd.f32 %v772_v15, %v416_v13  ;;  %v452_v38 = vadd.f32 %v451_v12, %v433_v34 }
  0xb1   :  { %v436_v23 = vadd.f32 %v435_v14, %v417_v18  ;;  %v471_v45 = vadd.f32 %v470_v16, %v452_v38 }
  0xb6   :  { %v454_v19 = vpop.f32.mrf.mxu2  ;;  %v418_v20 = vpop.f32.mrf.mxu0 }
  0xb7   :  { %v437_v21 = vpop.f32.mrf.mxu1  ;;  %v455_v25 = vadd.f32 %v454_v19, %v436_v23  ;;  %v473_v26 = vpop.f32.mrf.mxu3  ;;  %v419_v28 = vadd.f32 %v772_v15, %v418_v20 }
  0xb9   :  { %v474_v30 = vadd.f32 %v473_v26, %v455_v25  ;;  %v438_v35 = vadd.f32 %v437_v21, %v419_v28 }
  0xbe   :  { %v456_v31 = vpop.f32.mrf.mxu2  ;;  %v487_v32 = vpop.f32.mrf.mxu0 }
  0xbf   :  { %v492_v33 = vpop.f32.mrf.mxu1  ;;  %v488_v36 = vadd.f32 %v487_v32, %v469_v29  ;;  %v457_v39 = vadd.f32 %v456_v31, %v438_v35  ;;  %v475_v44 = vpop.f32.mrf.mxu3 }
  0xc0   :  { %v493_v37 = vadd.f32 %v492_v33, %v474_v30 }
  0xc1   :  { %v497_v40 = vmax.f32 %v488_v36, 0.0  ;;  %v476_v46 = vadd.f32 %v475_v44, %v457_v39 }
  0xc2   :  { %v499_v41 = vmax.f32 %v493_v37, 0.0 }
  0xc3   :  { %v501_v42 = vpack.c.bf16 %v497_v40, %v497_v40 }
  0xc4   :  { %v503_v43 = vpack.c.bf16 %v499_v41, %v499_v41 }
  0xc5   :  { %506 = vst.msk [vmem:[%s995_s3] sm:$0xf] %vm505_vm0, %v501_v42 }
  0xc6   :  { %508 = vst.msk [vmem:[%s995_s3 + $0x8] sm:$0xf] %vm505_vm0, %v503_v43  ;;  %v489_v47 = vpop.f32.mrf.mxu0 }
  0xc7   :  { %v494_v48 = vpop.f32.mrf.mxu1  ;;  %v490_v49 = vadd.f32 %v489_v47, %v471_v45 }
  0xc8   :  { %v495_v50 = vadd.f32 %v494_v48, %v476_v46 }
  0xc9   :  { %v498_v51 = vmax.f32 %v490_v49, 0.0 }
  0xca   :  { %v500_v52 = vmax.f32 %v495_v50, 0.0 }
  0xcb   :  { %v502_v53 = vpack.c.bf16 %v498_v51, %v498_v51 }
  0xcc   :  { %v504_v54 = vpack.c.bf16 %v500_v52, %v500_v52 }
  0xcd   :  { %507 = vst.msk [vmem:[%s995_s3 + $0x4] sm:$0xf] %vm505_vm0, %v502_v53 }
  0xce   :  { %509 = vst.msk [vmem:[%s995_s3 + $0xc] sm:$0xf] %vm505_vm0, %v504_v54 }

// kernel: spatial_path_forward.5
= control target key start
LH: loop header
LB: loop body
LE: loop exit
PB: predicated region body
PF: predicated region fallthrough
CT: control target
= control target key end

     0   :  { %s936_s0 = inlined_call_operand.vmem [shape: bf16[8,640], index: 0, kind: input, shape index: {}]   ;;  %s937_s1 = inlined_call_operand.vmem [shape: bf16[640,64], index: 1, kind: input, shape index: {}]   ;;  %s938_s2 = inlined_call_operand.vmem [shape: f32[1,64], index: 2, kind: input, shape index: {}]   ;;  %s939_s3 = inlined_call_operand.vmem [shape: bf16[64,128], index: 3, kind: input, shape index: {}]   ;;  %s940_s4 = inlined_call_operand.vmem [shape: f32[1,128], index: 4, kind: input, shape index: {}]   ;;  %s941_s5 = inlined_call_operand.hbm [shape: f32[8,128], index: 5, kind: output, shape index: {}]  }
   0x1   :  { %v689_v0 = vld [vmem:[%s937_s1 + $0x38] sm:$0xff]  ;;  %v688_v3 = vld [vmem:[%s937_s1 + $0x30] sm:$0xff]  ;;  %v687_v8 = vld [vmem:[%s937_s1 + $0x28] sm:$0xff] }
   0x2   :  { %v705_v1 = vld [vmem:[%s937_s1 + $0xb8] sm:$0xff]  ;;  %367 = vmatpush.bf16.msra.mxu0 %v689_v0  ;;  %v704_v5 = vld [vmem:[%s937_s1 + $0xb0] sm:$0xff]  ;;  %v703_v9 = vld [vmem:[%s937_s1 + $0xa8] sm:$0xff] }
   0x3   :  { %v713_v2 = vld [vmem:[%s937_s1 + $0xf8] sm:$0xff]  ;;  %393 = vmatpush.bf16.msra.mxu2 %v705_v1  ;;  %v712_v6 = vld [vmem:[%s937_s1 + $0xf0] sm:$0xff]  ;;  %v711_v10 = vld [vmem:[%s937_s1 + $0xe8] sm:$0xff] }
   0x4   :  { %v697_v4 = vld [vmem:[%s937_s1 + $0x78] sm:$0xff]  ;;  %406 = vmatpush.bf16.msra.mxu3 %v713_v2  ;;  %v696_v7 = vld [vmem:[%s937_s1 + $0x70] sm:$0xff]  ;;  %v695_v11 = vld [vmem:[%s937_s1 + $0x68] sm:$0xff] }
   0x5   :  { %380 = vmatpush.bf16.msra.mxu1 %v697_v4  ;;  %v686_v12 = vld [vmem:[%s937_s1 + $0x20] sm:$0xff] }
   0x6   :  { %368 = vmatpush.bf16.msra.mxu0 %v688_v3  ;;  %v702_v13 = vld [vmem:[%s937_s1 + $0xa0] sm:$0xff] }
   0x7   :  { %394 = vmatpush.bf16.msra.mxu2 %v704_v5  ;;  %v710_v14 = vld [vmem:[%s937_s1 + $0xe0] sm:$0xff] }
   0x8   :  { %407 = vmatpush.bf16.msra.mxu3 %v712_v6  ;;  %v694_v15 = vld [vmem:[%s937_s1 + $0x60] sm:$0xff] }
   0x9   :  { %381 = vmatpush.bf16.msra.mxu1 %v696_v7 }
   0xa   :  { %369 = vmatpush.bf16.msra.mxu0 %v687_v8 }
   0xb   :  { %395 = vmatpush.bf16.msra.mxu2 %v703_v9 }
   0xc   :  { %408 = vmatpush.bf16.msra.mxu3 %v711_v10 }
   0xd   :  { %382 = vmatpush.bf16.msra.mxu1 %v695_v11 }
   0xe   :  { %10 = vsyncpa [#allocation3], 0  ;;  %370 = vmatpush.bf16.msra.mxu0 %v686_v12  ;;  %v685_v16 = vld [vmem:[%s937_s1 + $0x18] sm:$0xff]  ;;  %v684_v20 = vld [vmem:[%s937_s1 + $0x10] sm:$0xff]  ;;  %vm470_vm0 = vcmask 523264   ;;  %s755_s13 = smov [#allocation2]  }
   0xf   :  { %396 = vmatpush.bf16.msra.mxu2 %v702_v13  ;;  %v701_v17 = vld [vmem:[%s937_s1 + $0x98] sm:$0xff]  ;;  %v700_v21 = vld [vmem:[%s937_s1 + $0x90] sm:$0xff]  ;;  %v683_v24 = vld [vmem:[%s937_s1 + $0x8] sm:$0xff]  ;;  %s496_s16 = sshll.u32 %s941_s5, 4  ;;  %s497_s16 = int_to_ptr.hbm [resolvable:$true] %s496_s16 }
  0x10   :  { %409 = vmatpush.bf16.msra.mxu3 %v710_v14  ;;  %v709_v18 = vld [vmem:[%s937_s1 + $0xd8] sm:$0xff]  ;;  %v708_v22 = vld [vmem:[%s937_s1 + $0xd0] sm:$0xff]  ;;  %v22_v25 = vld [vmem:[%s936_s0] sm:$0xff] }
  0x11   :  { %383 = vmatpush.bf16.msra.mxu1 %v694_v15  ;;  %v693_v19 = vld [vmem:[%s937_s1 + $0x58] sm:$0xff]  ;;  %v692_v23 = vld [vmem:[%s937_s1 + $0x50] sm:$0xff]  ;;  %v699_v26 = vld [vmem:[%s937_s1 + $0x88] sm:$0xff]  ;;  %v112_v30 = vunpack.c.l.b16 %v22_v25  ;;  %v113_v38 = vunpack.c.h.b16 %v22_v25 }
  0x12   :  { %371 = vmatpush.bf16.msra.mxu0 %v685_v16  ;;  %v707_v27 = vld [vmem:[%s937_s1 + $0xc8] sm:$0xff]  ;;  %v682_v31 = vld [vmem:[%s937_s1] sm:$0xff]  ;;  %v721_v33 = vld [vmem:[%s937_s1 + $0x138] sm:$0xff] }
  0x13   :  { %397 = vmatpush.bf16.msra.mxu2 %v701_v17  ;;  %v23_v28 = vld [vmem:[%s936_s0 + $0x8] sm:$0xff]  ;;  %v698_v34 = vld [vmem:[%s937_s1 + $0x80] sm:$0xff]  ;;  %v117_v39 = vpack.c.b16 %v112_v30, %v112_v30  ;;  %v720_v41 = vld [vmem:[%s937_s1 + $0x130] sm:$0xff]  ;;  %v118_v43 = vpack.c.b16 %v113_v38, %v113_v38 }
  0x14   :  { %410 = vmatpush.bf16.msra.mxu3 %v709_v18  ;;  %v691_v29 = vld [vmem:[%s937_s1 + $0x48] sm:$0xff]  ;;  %v114_v32 = vunpack.c.l.b16 %v23_v28  ;;  %v115_v35 = vunpack.c.h.b16 %v23_v28  ;;  %v706_v36 = vld [vmem:[%s937_s1 + $0xc0] sm:$0xff]  ;;  %v717_v46 = vld [vmem:[%s937_s1 + $0x118] sm:$0xff] }
  0x15   :  { %384 = vmatpush.bf16.msra.mxu1 %v693_v19  ;;  %v690_v37 = vld [vmem:[%s937_s1 + $0x40] sm:$0xff]  ;;  %v719_v44 = vld [vmem:[%s937_s1 + $0x128] sm:$0xff]  ;;  %v716_v47 = vld [vmem:[%s937_s1 + $0x110] sm:$0xff] }
  0x16   :  { %372 = vmatpush.bf16.msra.mxu0 %v684_v20  ;;  %v119_v40 = vpack.c.b16 %v114_v32, %v114_v32  ;;  %v120_v42 = vpack.c.b16 %v115_v35, %v115_v35  ;;  %v718_v45 = vld [vmem:[%s937_s1 + $0x120] sm:$0xff]  ;;  %v715_v48 = vld [vmem:[%s937_s1 + $0x108] sm:$0xff]  ;;  %v24_v49 = vld [vmem:[%s936_s0 + $0x10] sm:$0xf] }
  0x17   :  { %398 = vmatpush.bf16.msra.mxu2 %v700_v21  ;;  %v116_v50 = vunpack.c.l.b16 %v24_v49  ;;  %v714_v51 = vld [vmem:[%s937_s1 + $0x100] sm:$0xff]  ;;  %v725_v53 = vld [vmem:[%s939_s3 + $0x18] sm:$0xff]  ;;  %v724_v54 = vld [vmem:[%s939_s3 + $0x10] sm:$0xff] }
  0x18   :  { %411 = vmatpush.bf16.msra.mxu3 %v708_v22  ;;  %v723_v55 = vld [vmem:[%s939_s3 + $0x8] sm:$0xff]  ;;  %v722_v56 = vld [vmem:[%s939_s3] sm:$0xff] }
  0x19   :  { %385 = vmatpush.bf16.msra.mxu1 %v692_v23  ;;  %v121_v52 = vpack.c.b16 %v116_v50, %v116_v50  ;;  %v727_v63 = vld [vmem:[%s938_s2] ss:$0 sm:$0xff]  ;;  %s494_s2 = sshll.u32 %s755_s13, 4  ;;  %s495_s2 = int_to_ptr.vmem [resolvable:$true] %s494_s2 }
  0x1a   :  { %373 = vmatpush.bf16.msra.mxu0 %v683_v24  ;;  %v728_v11 = vld [vmem:[%s940_s4] ss:$0 sm:$0xff] }
  0x1b   :  { %399 = vmatpush.bf16.msra.mxu2 %v699_v26 }
  0x1c   :  { %412 = vmatpush.bf16.msra.mxu3 %v707_v27 }
  0x1d   :  { %386 = vmatpush.bf16.msra.mxu1 %v691_v29 }
  0x1e   :  { %374 = vmatpush.bf16.msra.mxu0 %v682_v31 }
  0x1f   :  { %400 = vmatpush.bf16.msra.mxu2 %v698_v34 }
  0x20   :  { %413 = vmatpush.bf16.msra.mxu3 %v706_v36 }
  0x21   :  { %387 = vmatpush.bf16.msra.mxu1 %v690_v37  ;;  %375 = vmatmul.bf16.vlgmr.msra.gmra.mxu0 %v117_v39 }
  0x22   :  { %419 = vmatpush.bf16.msrb.mxu0 %v721_v33  ;;  %401 = vmatmul.bf16.vlgmr.msra.gmra.mxu2 %v119_v40 }
  0x23   :  { %414 = vmatmul.bf16.vlgmr.msra.gmra.mxu3 %v120_v42 }
  0x24   :  { %388 = vmatmul.bf16.vlgmr.msra.gmra.mxu1 %v118_v43 }
  0x25   :  { %478 = vmatpush.bf16.msrb.mxu1 %v725_v53 }
  0x26   :  { %420 = vmatpush.bf16.msrb.mxu0 %v720_v41 }
  0x29   :  { %479 = vmatpush.bf16.msrb.mxu1 %v724_v54 }
  0x2a   :  { %421 = vmatpush.bf16.msrb.mxu0 %v719_v44 }
  0x2d   :  { %480 = vmatpush.bf16.msrb.mxu1 %v723_v55 }
  0x2e   :  { %422 = vmatpush.bf16.msrb.mxu0 %v718_v45 }
  0x31   :  { %481 = vmatpush.bf16.msrb.mxu1 %v722_v56 }
  0x32   :  { %423 = vmatpush.bf16.msrb.mxu0 %v717_v46 }
  0x36   :  { %424 = vmatpush.bf16.msrb.mxu0 %v716_v47 }
  0x3a   :  { %425 = vmatpush.bf16.msrb.mxu0 %v715_v48 }
  0x3e   :  { %426 = vmatpush.bf16.msrb.mxu0 %v714_v51 }
  0x41   :  { %427 = vmatmul.bf16.vlgmr.msrb.gmra.mxu0 %v121_v52 }
  0x9e   :  { %v376_v57 = vpop.f32.mrf.mxu0 }
  0x9f   :  { %v377_v1 = vadd.f32 %v727_v63, %v376_v57 }
  0xa1   :  { %v389_v58 = vpop.f32.mrf.mxu1 }
  0xa2   :  { %v390_v3 = vadd.f32 %v389_v58, %v377_v1 }
  0xa5   :  { %v402_v59 = vpop.f32.mrf.mxu2 }
  0xa6   :  { %v378_v60 = vpop.f32.mrf.mxu0  ;;  %v415_v61 = vpop.f32.mrf.mxu3  ;;  %v403_v4 = vadd.f32 %v402_v59, %v390_v3 }
  0xa8   :  { %v416_v5 = vadd.f32 %v415_v61, %v403_v4 }
  0xa9   :  { %v391_v62 = vpop.f32.mrf.mxu1 }
  0xad   :  { %v404_v0 = vpop.f32.mrf.mxu2 }
  0xae   :  { %v417_v2 = vpop.f32.mrf.mxu3 }
  0xbe   :  { %v428_v6 = vpop.f32.mrf.mxu0 }
  0xbf   :  { %v429_v7 = vadd.f32 %v428_v6, %v416_v5 }
  0xc1   :  { %v432_v8 = vmax.f32 %v429_v7, 0.0 }
  0xc3   :  { %v433_v9 = vpack.c.bf16 %v432_v8, %v432_v8 }
  0xc5   :  { %681 = vmatmul.msk.bf16.vlgmr.msrb.gmra.mxu1 %vm470_vm0, %v433_v9 }
  0xc6   :  { %v430_v10 = vpop.f32.mrf.mxu0 }
 0x142   :  { %v483_v12 = vpop.f32.mrf.mxu1 }
 0x143   :  { %v484_v13 = vadd.f32 %v728_v11, %v483_v12 }
 0x145   :  { %v487_v14 = vmax.f32 %v484_v13, 0.0 }
 0x147   :  { %488 = vst [vmem:[#allocation2] sm:$0xff] %v487_v14 }
 0x148   :  { %499 = dma.vmem_to_hbm [thread:$0]  %s495_s2, 128, %s497_s16, [#allocation3]  }
 0x14a   :  { %v485_v15 = vpop.f32.mrf.mxu1 }
 0x14b   :  { %753 = dma.done.wait [#allocation3], 128  }
 0x14c   :  { %754 = vsyncadd [#allocation3], 4294967168 }
 0x14d   :  { %504 = vsyncpa [#allocation3], 1 }

</bundles_post_ra>
